<compile_context>
chip_gen: v6e
topology: v6e:2x2x1
jax: 0.10.0
libtpu: 0.0.40
codegen_flags: <defaults>
</compile_context>

<pallas_src>
import functools

import jax
import jax.numpy as jnp
from jax import lax
from jax.experimental import pallas as pl
from jax.experimental.pallas import tpu as pltpu

LN_EPS = 1e-12


def dual_embed_kernel(w_ref, c_ref, pw_ref, pc_ref,
                      gw_ref, gc_ref, bw_ref, bc_ref, out_ref, *, dw, h):
    """One (seq-tile, batch-tile) block per grid step.

    w_ref:  (TB, TL, Dw)   c_ref:  (TB, TL, Dc)
    pw_ref: (TL, Dw)       pc_ref: (TL, Dc)      (position table lane halves)
    gw/bw:  (1, Dw)        gc/bc:  (1, Dc)
    out_ref: (TB, TL, H)   with H = Dw + Dc
    """
    inv_h = jnp.float32(1.0 / h)

    # concat([w, c], -1) + pos — computed as two independent lane halves so no
    # cross-lane shuffle / materialized concat is needed on the input side.
    # Position halves broadcast over the batch-tile axis.
    xw = w_ref[...] + pw_ref[...][None]              # (TB, TL, Dw)
    xc = c_ref[...] + pc_ref[...][None]              # (TB, TL, Dc)

    # BertLayerNorm over the full hidden dim, two-pass (x - mu)^2 form.  The
    # cross-lane reductions ride the XLU slot and hide under the DMA stream.
    mu = (jnp.sum(xw, axis=-1, keepdims=True)
          + jnp.sum(xc, axis=-1, keepdims=True)) * inv_h        # (TB, TL, 1)
    dxw = xw - mu
    dxc = xc - mu
    var = (jnp.sum(dxw * dxw, axis=-1, keepdims=True)
           + jnp.sum(dxc * dxc, axis=-1, keepdims=True)) * inv_h
    rstd = lax.rsqrt(var + LN_EPS)                              # per-row, EUP

    yw = gw_ref[...] * (dxw * rstd) + bw_ref[...]
    yc = gc_ref[...] * (dxc * rstd) + bc_ref[...]

    # Two lane-range stores of the output tile.  When dw % 128 == 0 (preferred
    # deployment split, demo case B) both stores are lane-dense and unmasked;
    # otherwise the char half is lane-shifted, which hides under the HBM-bound
    # DMA stream of this kernel.
    out_ref[:, :, :dw] = yw
    out_ref[:, :, dw:] = yc


def _choose_tiles(B, L, Dw, Dc, max_tile_batch, max_tile_rows,
                  vmem_budget_bytes):
    """Pick (tile_b, tile_l): big per-step DMAs, double-buffered f32 working set
    under `vmem_budget_bytes`, tile_b | B, tile_l sublane-aligned and dividing L
    when that does not cost more than half the row tile."""
    H = Dw + Dc
    elem_cap = max(1, vmem_budget_bytes // (2 * 4))   # double-buffered float32

    def step_elems(tb, tl):
        # words+chars+out blocks, position halves, gamma/beta rows.
        return tb * tl * (2 * H) + tl * H + 2 * H

    tile_l = min(L, max_tile_rows)
    if tile_l < L:
        tile_l = max(8, (tile_l // 8) * 8)
        for t in range(tile_l, max(8, tile_l // 2) - 1, -8):
            if L % t == 0:                 # avoid a ragged, masked last step
                tile_l = t
                break

    tile_b = min(B, max_tile_batch)
    while tile_b > 1 and (B % tile_b != 0
                          or step_elems(tile_b, tile_l) > elem_cap):
        tile_b -= 1
    while tile_l > 8 and step_elems(tile_b, tile_l) > elem_cap:
        tile_l -= 8
    return tile_b, max(1, tile_l)


def transformer_dual_embedding(words, chars, pos_table, gamma, beta, *,
                               max_tile_batch=8, max_tile_rows=1024,
                               vmem_budget_bytes=12 << 20):
    """words: [B,L,Dw] f32, chars: [B,L,Dc] f32, pos_table: [max_pos,H] f32,
    gamma/beta: [H] f32  ->  [B,L,H] f32"""
    B, L, Dw = words.shape
    Dc = chars.shape[-1]
    H = Dw + Dc
    assert pos_table.shape[0] >= L and pos_table.shape[1] == H
    assert gamma.shape == (H,) and beta.shape == (H,)

    # position_ids = arange(L) -> static row slice of the embedding table
    # (glue), split into word / char lane halves so the kernel never
    # concatenates its inputs.
    pos_w = pos_table[:L, :Dw]
    pos_c = pos_table[:L, Dw:]
    gamma_w = gamma[:Dw].reshape(1, Dw)
    gamma_c = gamma[Dw:].reshape(1, Dc)
    beta_w = beta[:Dw].reshape(1, Dw)
    beta_c = beta[Dw:].reshape(1, Dc)

    tile_b, tile_l = _choose_tiles(B, L, Dw, Dc, max_tile_batch, max_tile_rows,
                                   vmem_budget_bytes)
    num_b = B // tile_b                # tile_b always divides B
    num_l = pl.cdiv(L, tile_l)

    kernel = functools.partial(dual_embed_kernel, dw=Dw, h=H)

    # Grid order (seq-tiles outer, batch-tiles inner): the position-table
    # halves keep block index (l, 0) across all inner batch steps, so Pallas
    # skips their re-DMA -> position table is fetched ~once per row tile
    # instead of once per (row tile, batch tile).  Both axes are independent
    # ("parallel") for megacore / 2-TC sharding.
    return pl.pallas_call(
        kernel,
        out_shape=jax.ShapeDtypeStruct((B, L, H), jnp.float32),
        grid=(num_l, num_b),
        in_specs=[
            pl.BlockSpec((tile_b, tile_l, Dw), lambda l, b: (b, l, 0)),
            pl.BlockSpec((tile_b, tile_l, Dc), lambda l, b: (b, l, 0)),
            pl.BlockSpec((tile_l, Dw), lambda l, b: (l, 0)),
            pl.BlockSpec((tile_l, Dc), lambda l, b: (l, 0)),
            pl.BlockSpec((1, Dw), lambda l, b: (0, 0)),
            pl.BlockSpec((1, Dc), lambda l, b: (0, 0)),
            pl.BlockSpec((1, Dw), lambda l, b: (0, 0)),
            pl.BlockSpec((1, Dc), lambda l, b: (0, 0)),
        ],
        out_specs=pl.BlockSpec((tile_b, tile_l, H), lambda l, b: (b, l, 0)),
        compiler_params=pltpu.CompilerParams(
            dimension_semantics=("parallel", "parallel"),
            vmem_limit_bytes=32 << 20),
    )(words, chars, pos_w, pos_c, gamma_w, gamma_c, beta_w, beta_c)


def reference(words, chars, pos_table, gamma, beta):
    L = words.shape[1]
    x = jnp.concatenate([words, chars], axis=-1) + pos_table[:L][None]
    mu = jnp.mean(x, axis=-1, keepdims=True)
    var = jnp.mean((x - mu) ** 2, axis=-1, keepdims=True)
    return gamma * ((x - mu) / jnp.sqrt(var + LN_EPS)) + beta


if __name__ == "__main__":
    def run_case(B, L, H, Dc, max_pos, **tile_kwargs):
        Dw = H - Dc
        key = jax.random.PRNGKey(0)
        k_w, k_c, k_p, k_g, k_b = jax.random.split(key, 5)

        # Synthetic stand-ins for word_to_vec(...) / char_encoder(...) outputs.
        words = jax.random.normal(k_w, (B, L, Dw), dtype=jnp.float32)
        chars = jax.random.normal(k_c, (B, L, Dc), dtype=jnp.float32)

        # nn.Embedding(max_position_embeddings, hidden_size, padding_idx=0).
        pos_table = 0.02 * jax.random.normal(k_p, (max_pos, H), dtype=jnp.float32)
        pos_table = pos_table.at[0].set(0.0)

        # BertLayerNorm params (non-trivial to exercise the affine part).
        gamma = 1.0 + 0.1 * jax.random.normal(k_g, (H,), dtype=jnp.float32)
        beta = 0.05 * jax.random.normal(k_b, (H,), dtype=jnp.float32)

        out = transformer_dual_embedding(words, chars, pos_table, gamma, beta,
                                         **tile_kwargs)
        out = jax.block_until_ready(out)
        ref = reference(words, chars, pos_table, gamma, beta)
        assert out.shape == (B, L, H)
        assert jnp.allclose(out, ref, atol=2e-5, rtol=2e-5), \
            float(jnp.max(jnp.abs(out - ref)))

    # Case A: module-default dims (hidden_size=350, char_embedding_dim=50 ->
    # Dw=300) at small B/L; tile caps forced down so the (num_l=2, num_b=2)
    # grid and the position-table reuse path are actually exercised.
    run_case(B=4, L=64, H=350, Dc=50, max_pos=256,
             max_tile_batch=2, max_tile_rows=32)

    # Case B: 128-aligned word/char split (Dw=256, Dc=128) -> every block is
    # lane-dense and both output stores are unmasked (preferred config).
    run_case(B=2, L=32, H=384, Dc=128, max_pos=64)

    print("KERNEL_OK")
</pallas_src>

<mosaic_0001>
module attributes {stable_mosaic.version = 11 : i64} {
  func.func @dual_embed_kernel(%arg0: i32, %arg1: i32, %arg2: memref<2x32x300xf32, #tpu.memory_space<vmem>>, %arg3: memref<2x32x50xf32, #tpu.memory_space<vmem>>, %arg4: memref<32x300xf32, #tpu.memory_space<vmem>>, %arg5: memref<32x50xf32, #tpu.memory_space<vmem>>, %arg6: memref<1x300xf32, #tpu.memory_space<vmem>>, %arg7: memref<1x50xf32, #tpu.memory_space<vmem>>, %arg8: memref<1x300xf32, #tpu.memory_space<vmem>>, %arg9: memref<1x50xf32, #tpu.memory_space<vmem>>, %arg10: memref<2x32x350xf32, #tpu.memory_space<vmem>>) attributes {dimension_semantics = [#tpu.dimension_semantics<parallel>, #tpu.dimension_semantics<parallel>], iteration_bounds = array<i64: 2, 2>, scalar_prefetch = 0 : i64, scratch_operands = 0 : i64, tpu.core_type = #tpu.core_type<tc>, window_params = [{transform_indices = @transform_0, window_bounds = array<i64: 2, 32, 300>}, {transform_indices = @transform_1, window_bounds = array<i64: 2, 32, 50>}, {transform_indices = @transform_2, window_bounds = array<i64: 32, 300>}, {transform_indices = @transform_3, window_bounds = array<i64: 32, 50>}, {pipeline_mode = #tpu.pipeline_mode<synchronous>, transform_indices = @transform_4, window_bounds = array<i64: 1, 300>}, {pipeline_mode = #tpu.pipeline_mode<synchronous>, transform_indices = @transform_5, window_bounds = array<i64: 1, 50>}, {pipeline_mode = #tpu.pipeline_mode<synchronous>, transform_indices = @transform_6, window_bounds = array<i64: 1, 300>}, {pipeline_mode = #tpu.pipeline_mode<synchronous>, transform_indices = @transform_7, window_bounds = array<i64: 1, 50>}, {transform_indices = @transform_8, window_bounds = array<i64: 2, 32, 350>}]} {
    %c0 = arith.constant 0 : index
    %c0_0 = arith.constant 0 : index
    %c0_1 = arith.constant 0 : index
    %0 = vector.load %arg2[%c0, %c0_0, %c0_1] : memref<2x32x300xf32, #tpu.memory_space<vmem>>, vector<2x32x300xf32>
    %c0_2 = arith.constant 0 : index
    %c0_3 = arith.constant 0 : index
    %1 = vector.load %arg4[%c0_2, %c0_3] : memref<32x300xf32, #tpu.memory_space<vmem>>, vector<32x300xf32>
    %2 = vector.shape_cast %1 : vector<32x300xf32> to vector<1x32x300xf32>
    %3 = vector.broadcast %2 : vector<1x32x300xf32> to vector<2x32x300xf32>
    %4 = arith.addf %0, %3 : vector<2x32x300xf32>
    %c0_4 = arith.constant 0 : index
    %c0_5 = arith.constant 0 : index
    %c0_6 = arith.constant 0 : index
    %5 = vector.load %arg3[%c0_4, %c0_5, %c0_6] : memref<2x32x50xf32, #tpu.memory_space<vmem>>, vector<2x32x50xf32>
    %c0_7 = arith.constant 0 : index
    %c0_8 = arith.constant 0 : index
    %6 = vector.load %arg5[%c0_7, %c0_8] : memref<32x50xf32, #tpu.memory_space<vmem>>, vector<32x50xf32>
    %7 = vector.shape_cast %6 : vector<32x50xf32> to vector<1x32x50xf32>
    %8 = vector.broadcast %7 : vector<1x32x50xf32> to vector<2x32x50xf32>
    %9 = arith.addf %5, %8 : vector<2x32x50xf32>
    %cst = arith.constant dense<0.000000e+00> : vector<2x32xf32>
    %10 = vector.multi_reduction <add>, %4, %cst [2] : vector<2x32x300xf32> to vector<2x32xf32>
    %11 = vector.shape_cast %10 : vector<2x32xf32> to vector<2x32x1xf32>
    %cst_9 = arith.constant dense<0.000000e+00> : vector<2x32xf32>
    %12 = vector.multi_reduction <add>, %9, %cst_9 [2] : vector<2x32x50xf32> to vector<2x32xf32>
    %13 = vector.shape_cast %12 : vector<2x32xf32> to vector<2x32x1xf32>
    %14 = arith.addf %11, %13 : vector<2x32x1xf32>
    %cst_10 = arith.constant 0.00285714283 : f32
    %15 = vector.broadcast %cst_10 : f32 to vector<2x32x1xf32>
    %16 = arith.mulf %14, %15 : vector<2x32x1xf32>
    %17 = vector.broadcast %16 : vector<2x32x1xf32> to vector<2x32x300xf32>
    %18 = arith.subf %4, %17 : vector<2x32x300xf32>
    %19 = vector.broadcast %16 : vector<2x32x1xf32> to vector<2x32x50xf32>
    %20 = arith.subf %9, %19 : vector<2x32x50xf32>
    %21 = arith.mulf %18, %18 : vector<2x32x300xf32>
    %cst_11 = arith.constant dense<0.000000e+00> : vector<2x32xf32>
    %22 = vector.multi_reduction <add>, %21, %cst_11 [2] : vector<2x32x300xf32> to vector<2x32xf32>
    %23 = vector.shape_cast %22 : vector<2x32xf32> to vector<2x32x1xf32>
    %24 = arith.mulf %20, %20 : vector<2x32x50xf32>
    %cst_12 = arith.constant dense<0.000000e+00> : vector<2x32xf32>
    %25 = vector.multi_reduction <add>, %24, %cst_12 [2] : vector<2x32x50xf32> to vector<2x32xf32>
    %26 = vector.shape_cast %25 : vector<2x32xf32> to vector<2x32x1xf32>
    %27 = arith.addf %23, %26 : vector<2x32x1xf32>
    %cst_13 = arith.constant 0.00285714283 : f32
    %28 = vector.broadcast %cst_13 : f32 to vector<2x32x1xf32>
    %29 = arith.mulf %27, %28 : vector<2x32x1xf32>
    %cst_14 = arith.constant 9.99999996E-13 : f32
    %30 = vector.broadcast %cst_14 : f32 to vector<2x32x1xf32>
    %31 = arith.addf %29, %30 : vector<2x32x1xf32>
    %32 = math.rsqrt %31 : vector<2x32x1xf32>
    %c0_15 = arith.constant 0 : index
    %c0_16 = arith.constant 0 : index
    %33 = vector.load %arg6[%c0_15, %c0_16] : memref<1x300xf32, #tpu.memory_space<vmem>>, vector<1x300xf32>
    %34 = vector.broadcast %32 : vector<2x32x1xf32> to vector<2x32x300xf32>
    %35 = arith.mulf %18, %34 : vector<2x32x300xf32>
    %36 = vector.shape_cast %33 : vector<1x300xf32> to vector<1x1x300xf32>
    %37 = vector.broadcast %36 : vector<1x1x300xf32> to vector<2x32x300xf32>
    %38 = arith.mulf %37, %35 : vector<2x32x300xf32>
    %c0_17 = arith.constant 0 : index
    %c0_18 = arith.constant 0 : index
    %39 = vector.load %arg8[%c0_17, %c0_18] : memref<1x300xf32, #tpu.memory_space<vmem>>, vector<1x300xf32>
    %40 = vector.shape_cast %39 : vector<1x300xf32> to vector<1x1x300xf32>
    %41 = vector.broadcast %40 : vector<1x1x300xf32> to vector<2x32x300xf32>
    %42 = arith.addf %38, %41 : vector<2x32x300xf32>
    %c0_19 = arith.constant 0 : index
    %c0_20 = arith.constant 0 : index
    %43 = vector.load %arg7[%c0_19, %c0_20] : memref<1x50xf32, #tpu.memory_space<vmem>>, vector<1x50xf32>
    %44 = vector.broadcast %32 : vector<2x32x1xf32> to vector<2x32x50xf32>
    %45 = arith.mulf %20, %44 : vector<2x32x50xf32>
    %46 = vector.shape_cast %43 : vector<1x50xf32> to vector<1x1x50xf32>
    %47 = vector.broadcast %46 : vector<1x1x50xf32> to vector<2x32x50xf32>
    %48 = arith.mulf %47, %45 : vector<2x32x50xf32>
    %c0_21 = arith.constant 0 : index
    %c0_22 = arith.constant 0 : index
    %49 = vector.load %arg9[%c0_21, %c0_22] : memref<1x50xf32, #tpu.memory_space<vmem>>, vector<1x50xf32>
    %50 = vector.shape_cast %49 : vector<1x50xf32> to vector<1x1x50xf32>
    %51 = vector.broadcast %50 : vector<1x1x50xf32> to vector<2x32x50xf32>
    %52 = arith.addf %48, %51 : vector<2x32x50xf32>
    %c0_23 = arith.constant 0 : index
    %c0_24 = arith.constant 0 : index
    %c0_25 = arith.constant 0 : index
    %53 = vector.load %arg10[%c0_23, %c0_24, %c0_25] : memref<2x32x350xf32, #tpu.memory_space<vmem>>, vector<2x32x300xf32>
    tpu.vector_store %arg10[%c0_23, %c0_24, %c0_25], %42 {strides = array<i32>} : memref<2x32x350xf32, #tpu.memory_space<vmem>>, vector<2x32x300xf32>,
    %c0_26 = arith.constant 0 : index
    %c0_27 = arith.constant 0 : index
    %c300 = arith.constant 300 : index
    %54 = vector.load %arg10[%c0_26, %c0_27, %c300] : memref<2x32x350xf32, #tpu.memory_space<vmem>>, vector<2x32x50xf32>
    tpu.vector_store %arg10[%c0_26, %c0_27, %c300], %52 {strides = array<i32>} : memref<2x32x350xf32, #tpu.memory_space<vmem>>, vector<2x32x50xf32>,
    return
  }
  func.func @transform_0(%arg0: i32, %arg1: i32) -> (i32, i32, i32) {
    %c0_i32 = arith.constant 0 : i32
    %c0_i32_0 = arith.constant 0 : i32
    return %arg1, %arg0, %c0_i32 : i32, i32, i32
  }
  func.func @transform_1(%arg0: i32, %arg1: i32) -> (i32, i32, i32) {
    %c0_i32 = arith.constant 0 : i32
    %c0_i32_0 = arith.constant 0 : i32
    return %arg1, %arg0, %c0_i32 : i32, i32, i32
  }
  func.func @transform_2(%arg0: i32, %arg1: i32) -> (i32, i32) {
    %c0_i32 = arith.constant 0 : i32
    %c0_i32_0 = arith.constant 0 : i32
    return %arg0, %c0_i32 : i32, i32
  }
  func.func @transform_3(%arg0: i32, %arg1: i32) -> (i32, i32) {
    %c0_i32 = arith.constant 0 : i32
    %c0_i32_0 = arith.constant 0 : i32
    return %arg0, %c0_i32 : i32, i32
  }
  func.func @transform_4(%arg0: i32, %arg1: i32) -> (i32, i32) {
    %c0_i32 = arith.constant 0 : i32
    %c0_i32_0 = arith.constant 0 : i32
    %c0_i32_1 = arith.constant 0 : i32
    return %c0_i32, %c0_i32_0 : i32, i32
  }
  func.func @transform_5(%arg0: i32, %arg1: i32) -> (i32, i32) {
    %c0_i32 = arith.constant 0 : i32
    %c0_i32_0 = arith.constant 0 : i32
    %c0_i32_1 = arith.constant 0 : i32
    return %c0_i32, %c0_i32_0 : i32, i32
  }
  func.func @transform_6(%arg0: i32, %arg1: i32) -> (i32, i32) {
    %c0_i32 = arith.constant 0 : i32
    %c0_i32_0 = arith.constant 0 : i32
    %c0_i32_1 = arith.constant 0 : i32
    return %c0_i32, %c0_i32_0 : i32, i32
  }
  func.func @transform_7(%arg0: i32, %arg1: i32) -> (i32, i32) {
    %c0_i32 = arith.constant 0 : i32
    %c0_i32_0 = arith.constant 0 : i32
    %c0_i32_1 = arith.constant 0 : i32
    return %c0_i32, %c0_i32_0 : i32, i32
  }
  func.func @transform_8(%arg0: i32, %arg1: i32) -> (i32, i32, i32) {
    %c0_i32 = arith.constant 0 : i32
    %c0_i32_0 = arith.constant 0 : i32
    return %arg1, %arg0, %c0_i32 : i32, i32, i32
  }
}

</mosaic_0001>

<bundles_post_ra>
// kernel: tpu_custom_call.1
= control target key start
LH: loop header
LB: loop body
LE: loop exit
PB: predicated region body
PF: predicated region fallthrough
CT: control target
= control target key end

     0   :  { %s2257_s0 = inlined_call_operand.hbm [shape: f32[4,64,300], index: 0, kind: input, shape index: {}]   ;;  %s2258_s1 = inlined_call_operand.vmem [shape: f32[4,64,50], index: 1, kind: input, shape index: {}]   ;;  %s2259_s2 = inlined_call_operand.vmem [shape: f32[64,300], index: 2, kind: input, shape index: {}]   ;;  %s2260_s3 = inlined_call_operand.vmem [shape: f32[64,50], index: 3, kind: input, shape index: {}]   ;;  %s2261_s4 = inlined_call_operand.vmem [shape: f32[1,300], index: 4, kind: input, shape index: {}]   ;;  %s2262_s5 = inlined_call_operand.vmem [shape: f32[1,50], index: 5, kind: input, shape index: {}]   ;;  %s2263_s6 = inlined_call_operand.vmem [shape: f32[1,300], index: 6, kind: input, shape index: {}]   ;;  %s2264_s7 = inlined_call_operand.vmem [shape: f32[1,50], index: 7, kind: input, shape index: {}]   ;;  %s2265_s8 = inlined_call_operand.hbm [shape: f32[4,64,350], index: 8, kind: output, shape index: {}]  }
   0x1   :  { %2273 = sst [smem:[#allocation22_spill]] %s2264_s7 }
   0x2   :  { %2274 = sst [smem:[#allocation23_spill]] %s2265_s8 }
   0x3   :  { %13 = vsyncpa [#allocation3], 0 }
   0x4   :  { %15 = vsyncpa [#allocation3 + $0x1], 0 }
   0x5   :  { %16 = vsyncpa [#allocation4], 0 }
   0x6   :  { %18 = vsyncpa [#allocation4 + $0x1], 0  ;;  %s1504_s27 = smov 0   ;;  %s1506_s28 = smov 0  }
   0x7   :  { %s1508_s29 = smov 0   ;;  %s1510_s30 = smov 0  }
   0x8   :  { %s1512_s9 = smov 0   ;;  %s1514_s10 = smov 0  }
   0x9   :  { %s1516_s11 = smov 0   ;;  %s1518_s12 = smov 0  }
   0xa LB: > { %2275 = sst [smem:[#allocation14_spill]] %s1415_s27  ;;  %s1218_s13 = sadd.s32 4294967295, %s1443_s12   ;;  %s1443_s12 = sphi %s1518_s12, %s24_s12   ;;  %s1439_s11 = sphi %s1516_s11, %s2302_s11   ;;  %s1435_s10 = sphi %s1514_s10, %s2301_s10   ;;  %s1431_s9 = sphi %s1512_s9, %s2300_s9   ;;  %s1427_s30 = sphi %s1510_s30, %s2299_s30   ;;  %s1423_s29 = sphi %s1508_s29, %s2294_s29   ;;  %s1419_s28 = sphi %s1506_s28, %s2298_s28   ;;  %s1415_s27 = sphi %s1504_s27, %s2297_s27  }
   0xb   : > { %2276 = sst [smem:[#allocation15_spill]] %s1423_s29  ;;  %s1219_s14 = sadd.s32 4294967294, %s1443_s12  }
   0xc   : > { %2277 = sst [smem:[#allocation16_spill]] %s1427_s30  ;;  %s33_s15 = sadd.s32 1, %s1435_s10 }
   0xd   : > { %p34_p0 = scmp.ge.s32.totalorder %s33_s15, 2  ;;  %s36_s16 = sadd.s32 1, %s1439_s11 }
   0xe   : > { %p52_p1 = scmp.ne.s32.totalorder %s1423_s29, %s1419_s28  ;;  %p53_p2 = scmp.eq.s32.totalorder %s1443_s12, 0 }
   0xf   : > { %s2304_s15 = smov (%p34_p0, %s33_s15), 0  ;;  %s2306_s16 = smov (!%p34_p0, %s36_s16), %s1439_s11 }
  0x10   : > { %2278 = sst [smem:[#allocation17_spill]] %s2304_s15  ;;  %s40_s17 = ssub.s32 %s1435_s10, %s2304_s15 }
  0x11   : > { %p1556_p3 = por %p53_p2, %p52_p1  ;;  %p38_p4 = scmp.ge.s32.totalorder %s2306_s16, 2 }
  0x12   : > { %p58_p5 = scmp.ne.s32.totalorder %s1419_s28, %s1415_s27  ;;  %p59_p6 = scmp.eq.s32.totalorder %s1218_s13, 0 }
  0x13   : > { %p248_p7 = scmp.eq.s32.totalorder %s1218_s13, 3  ;;  %s2308_s16 = smov (%p38_p4, %s2306_s16), 0 }
  0x14   : > { %2280 = sst [smem:[#allocation18_spill]] %s2308_s16  ;;  %p1564_p8 = por %p59_p6, %p58_p5 }
  0x15   : > { %p1568_p9 = por %p248_p7, %p52_p1  ;;  %s41_s21 = ssub.s32 %s1439_s11, %s2308_s16 }
  0x16   : > { %p254_p10 = scmp.eq.s32.totalorder %s1219_s14, 3  ;;  %s42_s22 = sor.u32 %s41_s21, %s40_s17 }
  0x17   : > { %s2282_s20 = scalar_select %p1568_p9, 1, 0 }
  0x18   : > { %s45_s23 = sadd.s32 1, %s1423_s29  ;;  %p43_p11 = scmp.eq.s32.totalorder %s42_s22, 0 }
  0x19   : > { %2283 = sst [smem:[#allocation19_spill]] %s2282_s20  ;;  %p1575_p12 = por %p254_p10, %p58_p5 }
  0x1a   : > { %s1580_s25 = scalar_select %p43_p11, %s1423_s29, %s45_s23  }
  0x1b   : > { %s2284_s24 = scalar_select %p1575_p12, 1, 0 }
  0x1c   : > { %2286 = sst [smem:[#allocation21_spill]] %s1580_s25  ;;  %p1221_p13 = scmp.ge.s32.totalorder %s1443_s12, 4 }
  0x1d   : > { %2285 = sst [smem:[#allocation20_spill]] %s2284_s24 }
  0x1e   : > { %282 = sbr.rel (%p1221_p13) target bundleno = 60 (0x3c), region = 32 }
  0x23   : > { %s1584_s26 = sand.u32 1, %s1423_s29   ;;  %s1251_s13 = smul.u32 12, %s1439_s11 }
  0x24   : > { %s1250_s14 = smul.u32 192, %s1584_s26  ;;  %s1445_s21 = smov 3072  }
  0x25   : > { %s1252_s17 = smul.u32 48, %s1435_s10  ;;  %1258 = sst [smem:[#allocation8]] (%p1556_p3), %s1445_s21 }
  0x26   : > { %s290_s23 = scalar_lea.vmem [#allocation2], %s1250_s14  ;;  %s1446_s25 = smov 1536  }
  0x27   : > { %s298_s22 = sadd.s32 %s1252_s17, %s1251_s13  ;;  %s313_s16 = sshll.u32 %s290_s23, 4  ;;  %s314_s16 = int_to_ptr.vmem [resolvable:$true] %s313_s16 }
  0x28   : > { %s1257_s15 = scalar_select %p1556_p3, [#allocation0], [#allocation11] }
  0x29   : > { %1259 = sst [smem:[#allocation8 + $0x1]] (%p1556_p3), %s1446_s25  ;;  %s1447_s24 = smov 4  }
  0x2a   : > { %s305_s29 = sld [smem:[%s1257_s15]]   ;;  %s1226_s27 = sshll.u32 %s298_s22, 7 }
  0x2b   : > { %1260 = sst [smem:[#allocation8 + $0x2]] (%p1556_p3), %s1447_s24  ;;  %s1448_s8 = smov 384  }
  0x2c   : > { %1261 = sst [smem:[#allocation8 + $0x3]] (%p1556_p3), %s1448_s8  ;;  %s1449_s13 = smov 24  }
  0x2d   : > { %1262 = sst [smem:[#allocation8 + $0x4]] (%p1556_p3), %s1448_s8  ;;  %s300_s21 = scalar_lea.hbm %s2257_s0, %s1226_s27 }
  0x2e   : > { %1263 = sst [smem:[#allocation8 + $0x5]] (%p1556_p3), %s1449_s13  ;;  %s287_s15 = scalar_lea.sflag [#allocation3], %s1584_s26 }
  0x2f   : > { %s1450_s20 = smov 131072   ;;  %335 = sbr.rel (!%p1556_p3) target bundleno = 60 (0x3c), region = 40 }
  0x30   : > { %s1227_s25 = sshll.u32 %s305_s29, 26  ;;  %s1229_s8 = sshll.u32 (%p1556_p3), %s1584_s26, 6 }
  0x31   : > { %s1228_s23 = sadd.s32 134217728, %s1227_s25  ;;  %s1231_s24 = sshll.u32 (%p1556_p3), %s1439_s11, 2 }
  0x32   : > { %1264 = dma.general (%p1556_p3), %s300_s21, 3072, %s314_s16, %s287_s15, %s1450_s20, [#allocation8], %s1228_s23, 0  }
  0x33   : > { %s1249_s22 = sshll.u32 (%p1556_p3), %s1435_s10, 4  ;;  %s339_s29 = scalar_lea.vmem (%p1556_p3), [#allocation5], %s1229_s8 }
  0x34   : > { %s343_s13 = sadd.s32 %s1249_s22, %s1231_s24 }
  0x35   : > { %s1233_s30 = sshll.u32 %s343_s13, 3 }
  0x36   : > { %s345_s27 = scalar_lea.vmem %s2258_s1, %s1233_s30 }
  0x37   : > { %v388_v0 = vld [vmem:[%s345_s27] sm:$0xff]  ;;  %v390_v1 = vld [vmem:[%s345_s27 + $0x8] sm:$0xff]  ;;  %v392_v2 = vld [vmem:[%s345_s27 + $0x10] sm:$0xff] }
  0x38   : > { %389 = vst [vmem:[%s339_s29] sm:$0xff] %v388_v0  ;;  %391 = vst [vmem:[%s339_s29 + $0x8] sm:$0xff] %v390_v1  ;;  %v394_v3 = vld [vmem:[%s345_s27 + $0x18] sm:$0xff]  ;;  %v396_v4 = vld [vmem:[%s345_s27 + $0x40] sm:$0xff] }
  0x39   : > { %393 = vst [vmem:[%s339_s29 + $0x10] sm:$0xff] %v392_v2  ;;  %v398_v5 = vld [vmem:[%s345_s27 + $0x48] sm:$0xff]  ;;  %395 = vst [vmem:[%s339_s29 + $0x18] sm:$0xff] %v394_v3  ;;  %v400_v6 = vld [vmem:[%s345_s27 + $0x50] sm:$0xff] }
  0x3a   : > { %397 = vst [vmem:[%s339_s29 + $0x20] sm:$0xff] %v396_v4  ;;  %399 = vst [vmem:[%s339_s29 + $0x28] sm:$0xff] %v398_v5  ;;  %v402_v7 = vld [vmem:[%s345_s27 + $0x58] sm:$0xff] }
  0x3b   : > { %401 = vst [vmem:[%s339_s29 + $0x30] sm:$0xff] %v400_v6  ;;  %403 = vst [vmem:[%s339_s29 + $0x38] sm:$0xff] %v402_v7 }
  0x3c PF: > { %p1234_p0 = scmp.ge.s32.totalorder %s1443_s12, 1  ;;  %p427_p1 = scmp.lt.s32.totalorder %s1443_s12, 5 }
  0x3e   : > { %p428_p2 = pnand %p1234_p0, %p427_p1 }
  0x3f   : > { %s1620_s7 = sand.u32 (!%p428_p2), 1, %s1419_s28  }
  0x40   : > { %431 = sbr.rel (%p428_p2) target bundleno = 570 (0x23a), region = 86  ;;  %s434_s16 = scalar_lea.sflag (!%p428_p2), [#allocation3], %s1620_s7 }
  0x41   : > { %s1253_s30 = smul.u32 (!%p428_p2), 192, %s1620_s7 }
  0x43   : > { %s1626_s18 = scalar_lea.vmem (!%p428_p2), [#allocation2], %s1253_s30 }
  0x45   : > { %1406 = dma.done.wait (%p1564_p8), %s434_s16, 3072  }
  0x46   : > { %1408 = vsyncadd (%p1564_p8), %s434_s16, 4294964224  ;;  %s1236_s20 = sshll.u32 %s1431_s9, 2  ;;  %v517_v8 = vld [vmem:[%s1626_s18 + $0x30] sm:$0xff]  ;;  %v518_v9 = vld [vmem:[%s1626_s18 + $0x38] sm:$0xff]  ;;  %vm592_vm0 = vcmask 359424   ;;  %s1235_s19 = sshll.u32 %s1620_s7, 6 }
  0x47   : > { %p497_p3 = scmp.lt.s32.totalorder %s1236_s20, 7  ;;  %v519_v10 = vld [vmem:[%s1626_s18 + $0x40] sm:$0xff]  ;;  %v512_v18 = vld [vmem:[%s1626_s18 + $0x8] sm:$0xff]  ;;  %v513_v19 = vld [vmem:[%s1626_s18 + $0x10] sm:$0xff]  ;;  %s1772_s22 = scalar_lea.vmem [#allocation5], %s1235_s19  ;;  %vm632_vm1 = vcmask 408576  }
  0x48   : > { %v511_v17 = vld [vmem:[%s1626_s18] sm:$0xff]  ;;  %v520_v27 = vld [vmem:[%s1626_s18 + $0x48] sm:$0xff]  ;;  %v521_v28 = vld [vmem:[%s1626_s18 + $0x50] sm:$0xff]  ;;  %s2287_s17 = sld [smem:[#allocation22_spill]]  ;;  %s1451_s21 = smov 44   ;;  %vm1033_vm2 = vcmask 769376  }
  0x49   : > { %s2310_s20 = smov (!%p497_p3, %s1236_s20), 7  ;;  %v522_v29 = vld [vmem:[%s1626_s18 + $0x58] sm:$0xff]  ;;  %v515_v39 = vld [vmem:[%s1626_s18 + $0x20] sm:$0xff]  ;;  %v516_v40 = vld [vmem:[%s1626_s18 + $0x28] sm:$0xff] }
  0x4a   : > { %s1254_s26 = smul.u32 24, %s2310_s20  ;;  %v514_v38 = vld [vmem:[%s1626_s18 + $0x18] sm:$0xff]  ;;  %v527_v51 = vld [vmem:[%s1626_s18 + $0x80] sm:$0xff]  ;;  %v528_v52 = vld [vmem:[%s1626_s18 + $0x88] sm:$0xff]  ;;  %s1239_s23 = sshll.u32 %s2310_s20, 3 }
  0x4b   : > { %v526_v50 = vld [vmem:[%s1626_s18 + $0x78] sm:$0xff]  ;;  %v523_v57 = vld [vmem:[%s1626_s18 + $0x60] sm:$0xff]  ;;  %v524_v58 = vld [vmem:[%s1626_s18 + $0x68] sm:$0xff]  ;;  %s1745_s24 = scalar_lea.vmem %s2260_s3, %s1239_s23 }
  0x4c   : > { %s1639_s25 = scalar_lea.vmem %s2259_s2, %s1254_s26  ;;  %v525_v59 = vld [vmem:[%s1626_s18 + $0x70] sm:$0xff]  ;;  %v532_v0 = vld [vmem:[%s1626_s18 + $0xa8] sm:$0xff]  ;;  %v534_v2 = vld [vmem:[%s1626_s18 + $0xb8] sm:$0xff] }
  0x4d   : > { %v1645_v11 = vld [vmem:[%s1639_s25 + $0x30] sm:$0xff]  ;;  %v1648_v12 = vld [vmem:[%s1639_s25 + $0x38] sm:$0xff]  ;;  %v1651_v13 = vld [vmem:[%s1639_s25 + $0x40] sm:$0xff] }
  0x4e   : > { %v1654_v14 = vadd.f32 %v1645_v11, %v517_v8  ;;  %v1657_v15 = vadd.f32 %v1648_v12, %v518_v9  ;;  %v1660_v16 = vadd.f32 %v1651_v13, %v519_v10  ;;  %v535_v20 = vld [vmem:[%s1639_s25] sm:$0xff]  ;;  %v536_v21 = vld [vmem:[%s1639_s25 + $0x8] sm:$0xff]  ;;  %v537_v22 = vld [vmem:[%s1639_s25 + $0x10] sm:$0xff] }
  0x4f   : > { %v1672_v25 = vadd.f32 %v535_v20, %v511_v17  ;;  %v1674_v26 = vadd.f32 %v536_v21, %v512_v18  ;;  %v1679_v30 = vadd.f32 %v537_v22, %v513_v19  ;;  %v544_v31 = vld [vmem:[%s1639_s25 + $0x48] sm:$0xff]  ;;  %v545_v32 = vld [vmem:[%s1639_s25 + $0x50] sm:$0xff]  ;;  %v546_v33 = vld [vmem:[%s1639_s25 + $0x58] sm:$0xff]  ;;  %v1726_v63 = vadd.f32 %v535_v20, %v523_v57 }
  0x50   : > { %v602_v23 = vadd.f32 %v1657_v15, %v1654_v14  ;;  %v603_v24 = vsel %vm592_vm0, %v1660_v16, 0.0  ;;  %v1686_v36 = vadd.f32 %v544_v31, %v520_v27  ;;  %v1688_v37 = vadd.f32 %v545_v32, %v521_v28  ;;  %v538_v43 = vld [vmem:[%s1639_s25 + $0x18] sm:$0xff]  ;;  %v539_v44 = vld [vmem:[%s1639_s25 + $0x20] sm:$0xff]  ;;  %v540_v45 = vld [vmem:[%s1639_s25 + $0x28] sm:$0xff]  ;;  %s2067_s25 = scalar_lea.vmem [#allocation6], %s1253_s30  ;;  %s1043_s30 = scalar_lea.sflag [#allocation4], %s1620_s7 }
  0x51   : > { %v591_v35 = vadd.f32 %v1674_v26, %v1672_v25  ;;  %v593_v41 = vsel %vm592_vm0, %v1679_v30, 0.0  ;;  %v1695_v42 = vadd.f32 %v546_v33, %v522_v29  ;;  %v1702_v48 = vadd.f32 %v538_v43, %v514_v38  ;;  %v533_v1 = vld [vmem:[%s1626_s18 + $0xb0] sm:$0xff]  ;;  %v530_v8 = vld [vmem:[%s1626_s18 + $0x98] sm:$0xff]  ;;  %v531_v9 = vld [vmem:[%s1626_s18 + $0xa0] sm:$0xff] }
  0x52   : > { %v604_v34 = vadd.f32 %v603_v24, %v602_v23  ;;  %v607_v47 = vadd.f32 %v1688_v37, %v1686_v36  ;;  %v1704_v49 = vadd.f32 %v539_v44, %v515_v39  ;;  %v1713_v54 = vadd.f32 %v540_v45, %v516_v40  ;;  %v529_v7 = vld [vmem:[%s1626_s18 + $0x90] sm:$0xff]  ;;  %v579_v38 = vld [vmem:[%s1745_s24] sm:$0xff] }
  0x53   : > { %v594_v46 = vadd.f32 %v593_v41, %v591_v35  ;;  %v608_v53 = vsel %vm592_vm0, %v1695_v42, 0.0  ;;  %v1715_v55 = vadd.f32 %v538_v43, %v526_v50  ;;  %v1717_v56 = vadd.f32 %v539_v44, %v527_v51  ;;  %v571_v35 = vld [vmem:[%s1772_s22] sm:$0xff]  ;;  %v574_v41 = vld [vmem:[%s1772_s22 + $0x18] sm:$0xff]  ;;  %v576_v51 = vld [vmem:[%s1772_s22 + $0x28] sm:$0xff] }
  0x54   : > { %605 = vadd.xlane.f32.xlu1 %v604_v34  ;;  %v609_v60 = vadd.f32 %v608_v53, %v607_v47  ;;  %v597_v61 = vadd.f32 %v1704_v49, %v1702_v48  ;;  %v1724_v62 = vadd.f32 %v540_v45, %v528_v52  ;;  %v598_v3 = vsel %vm592_vm0, %v1713_v54, 0.0  ;;  %v582_v43 = vld [vmem:[%s1745_s24 + $0x18] sm:$0xff]  ;;  %v573_v45 = vld [vmem:[%s1772_s22 + $0x10] sm:$0xff]  ;;  %v575_v57 = vld [vmem:[%s1772_s22 + $0x20] sm:$0xff] }
  0x55   : > { %595 = vadd.xlane.f32.xlu0 %v594_v46  ;;  %v617_v4 = vadd.f32 %v1717_v56, %v1715_v55  ;;  %v1735_v5 = vadd.f32 %v536_v21, %v524_v58  ;;  %v1737_v6 = vadd.f32 %v537_v22, %v525_v59  ;;  %v1749_v18 = vadd.f32 %v544_v31, %v532_v0  ;;  %v572_v31 = vld [vmem:[%s1772_s22 + $0x8] sm:$0xff]  ;;  %v581_v46 = vld [vmem:[%s1745_s24 + $0x10] sm:$0xff] }
  0x56   : > { %v599_v10 = vadd.f32 %v598_v3, %v597_v61  ;;  %v618_v17 = vsel %vm592_vm0, %v1724_v62, 0.0  ;;  %v1751_v19 = vadd.f32 %v545_v32, %v533_v1  ;;  %v1757_v23 = vadd.f32 %v546_v33, %v534_v2  ;;  %v580_v32 = vld [vmem:[%s1745_s24 + $0x8] sm:$0xff]  ;;  %v577_v1 = vld [vmem:[%s1772_s22 + $0x30] sm:$0xff] }
  0x57   : > { %v619_v20 = vadd.f32 %v618_v17, %v617_v4  ;;  %v612_v21 = vadd.f32 %v1735_v5, %v1726_v63  ;;  %v613_v22 = vsel %vm592_vm0, %v1737_v6, 0.0  ;;  %v1762_v27 = vadd.f32 %v1645_v11, %v529_v7 }
  0x58   : > { %610 = vadd.xlane.f32.xlu1 %v609_v60  ;;  %v627_v24 = vadd.f32 %v1751_v19, %v1749_v18  ;;  %v1765_v28 = vadd.f32 %v1648_v12, %v530_v8  ;;  %v1768_v29 = vadd.f32 %v1651_v13, %v531_v9  ;;  %v628_v11 = vsel %vm592_vm0, %v1757_v23, 0.0  ;;  %v578_v60 = vld [vmem:[%s1772_s22 + $0x38] sm:$0xff] }
  0x59   : > { %600 = vadd.xlane.f32.xlu0 %v599_v10  ;;  %v614_v33 = vadd.f32 %v613_v22, %v612_v21  ;;  %v584_v39 = vadd.f32 %v580_v32, %v572_v31  ;;  %v583_v44 = vadd.f32 %v579_v38, %v571_v35  ;;  %v586_v50 = vadd.f32 %v582_v43, %v574_v41 }
  0x5a   : > { %v629_v12 = vadd.f32 %v628_v11, %v627_v24  ;;  %v622_v13 = vadd.f32 %v1765_v28, %v1762_v27  ;;  %v623_v34 = vsel %vm592_vm0, %v1768_v29, 0.0  ;;  %v1791_v53 = vadd.f32 %v581_v46, %v573_v45 }
  0x5b   : > { %v636_v47 = vsel %vm632_vm1, %v584_v39, 0.0  ;;  %v633_v52 = vsel %vm632_vm1, %v583_v44, 0.0  ;;  %v642_v58 = vsel %vm632_vm1, %v586_v50, 0.0  ;;  %v1795_v59 = vadd.f32 %v580_v32, %v576_v51 }
  0x5c   : > { %620 = vadd.xlane.f32.xlu1 %v619_v20  ;;  %v624_v40 = vadd.f32 %v623_v34, %v622_v13  ;;  %v639_v61 = vsel %vm632_vm1, %v1791_v53, 0.0  ;;  %v1800_v0 = vadd.f32 %v579_v38, %v575_v57  ;;  %v1805_v3 = vadd.f32 %v582_v43, %v578_v60 }
  0x5d   : > { %615 = vadd.xlane.f32.xlu0 %v614_v33  ;;  %v648_v2 = vsel %vm632_vm1, %v1795_v59, 0.0  ;;  %v1809_v7 = vadd.f32 %v581_v46, %v577_v1 }
  0x5e   : > { %v645_v4 = vsel %vm632_vm1, %v1800_v0, 0.0  ;;  %v654_v8 = vsel %vm632_vm1, %v1805_v3, 0.0 }
  0x5f   : > { %v651_v9 = vsel %vm632_vm1, %v1809_v7, 0.0 }
  0x60   : > { %630 = vadd.xlane.f32.xlu1 %v629_v12 }
  0x61   : > { %625 = vadd.xlane.f32.xlu0 %v624_v40 }
  0x64   : > { %637 = vadd.xlane.f32.xlu1 %v636_v47 }
  0x65   : > { %634 = vadd.xlane.f32.xlu0 %v633_v52 }
  0x68   : > { %643 = vadd.xlane.f32.xlu1 %v642_v58 }
  0x69   : > { %640 = vadd.xlane.f32.xlu0 %v639_v61 }
  0x6c   : > { %649 = vadd.xlane.f32.xlu1 %v648_v2 }
  0x6d   : > { %646 = vadd.xlane.f32.xlu0 %v645_v4 }
  0x70   : > { %655 = vadd.xlane.f32.xlu1 %v654_v8 }
  0x71   : > { %652 = vadd.xlane.f32.xlu0 %v651_v9 }
  0xdd   : > { %v606_v10 = vpop.xlane.xlu1 %605 }
  0xde   : > { %v596_v17 = vpop.xlane.xlu0 %595 }
  0xe1   : > { %v611_v20 = vpop.xlane.xlu1 %610 }
  0xe2   : > { %v601_v21 = vpop.xlane.xlu0 %600 }
  0xe5   : > { %v621_v22 = vpop.xlane.xlu1 %620 }
  0xe6   : > { %v616_v24 = vpop.xlane.xlu0 %615 }
  0xe9   : > { %v631_v31 = vpop.xlane.xlu1 %630 }
  0xea   : > { %v626_v32 = vpop.xlane.xlu0 %625 }
  0xed   : > { %v638_v33 = vpop.xlane.xlu1 %637 }
  0xee   : > { %v658_v11 = vadd.f32 %v638_v33, %v601_v21  ;;  %v635_v12 = vpop.xlane.xlu0 %634 }
  0xef   : > { %v657_v34 = vadd.f32 %v635_v12, %v596_v17 }
  0xf0   : > { %v666_v13 = vmul.f32 0.0028571428, %v658_v11 }
  0xf1   : > { %v644_v35 = vpop.xlane.xlu1 %643  ;;  %v665_v38 = vmul.f32 0.0028571428, %v657_v34 }
  0xf2   : > { %v660_v40 = vadd.f32 %v644_v35, %v611_v20  ;;  %v1815_v41 = vsub.f32 %v584_v39, %v666_v13  ;;  %v1818_v43 = vsub.f32 %v1702_v48, %v666_v13  ;;  %v641_v45 = vpop.xlane.xlu0 %640  ;;  %v1821_v46 = vsub.f32 %v1704_v49, %v666_v13 }
  0xf3   : > { %v1824_v47 = vsub.f32 %v1713_v54, %v666_v13  ;;  %v659_v52 = vadd.f32 %v641_v45, %v606_v10  ;;  %v1828_v58 = vsub.f32 %v583_v44, %v665_v38  ;;  %v1837_v54 = vsub.f32 %v1672_v25, %v665_v38 }
  0xf4   : > { %v668_v51 = vmul.f32 0.0028571428, %v660_v40  ;;  %v770_v57 = vmul.f32 %v1815_v41, %v1815_v41  ;;  %v708_v39 = vmul.f32 %v1818_v43, %v1818_v43  ;;  %v709_v48 = vmul.f32 %v1821_v46, %v1821_v46 }
  0xf5   : > { %v650_v60 = vpop.xlane.xlu1 %649  ;;  %v710_v49 = vmul.f32 %v1824_v47, %v1824_v47  ;;  %v667_v61 = vmul.f32 0.0028571428, %v659_v52  ;;  %v769_v44 = vmul.f32 %v1828_v58, %v1828_v58  ;;  %v1845_v10 = vsub.f32 %v1674_v26, %v665_v38 }
  0xf6   : > { %v662_v1 = vadd.f32 %v650_v60, %v621_v22  ;;  %v780_v2 = vsel %vm632_vm1, %v770_v57, 0.0  ;;  %v647_v4 = vpop.xlane.xlu0 %646  ;;  %v1842_v8 = vsub.f32 %v586_v50, %v668_v51  ;;  %v734_v9 = vadd.f32 %v709_v48, %v708_v39 }
  0xf7   : > { %781 = vadd.xlane.f32.xlu1 %v780_v2  ;;  %v661_v20 = vadd.f32 %v647_v4, %v616_v24  ;;  %v777_v25 = vsel %vm632_vm1, %v769_v44, 0.0  ;;  %v1849_v21 = vsub.f32 %v1791_v53, %v667_v61  ;;  %v735_v11 = vsel %vm592_vm0, %v710_v49, 0.0 }
  0xf8   : > { %v670_v17 = vmul.f32 0.0028571428, %v662_v1  ;;  %778 = vadd.xlane.f32.xlu0 %v777_v25  ;;  %v772_v33 = vmul.f32 %v1842_v8, %v1842_v8  ;;  %v1855_v50 = vsub.f32 %v1679_v30, %v665_v38  ;;  %v705_v26 = vmul.f32 %v1837_v54, %v1837_v54 }
  0xf9   : > { %v656_v22 = vpop.xlane.xlu1 %655  ;;  %v669_v12 = vmul.f32 0.0028571428, %v661_v20  ;;  %v771_v13 = vmul.f32 %v1849_v21, %v1849_v21  ;;  %v706_v40 = vmul.f32 %v1845_v10, %v1845_v10  ;;  %v1870_v38 = vsub.f32 %v1686_v36, %v668_v51 }
  0xfa   : > { %v664_v24 = vadd.f32 %v656_v22, %v631_v31  ;;  %v1862_v53 = vsub.f32 %v1795_v59, %v670_v17  ;;  %v653_v34 = vpop.xlane.xlu0 %652  ;;  %v786_v35 = vsel %vm632_vm1, %v772_v33, 0.0  ;;  %v707_v30 = vmul.f32 %v1855_v50, %v1855_v50 }
  0xfb   : > { %v663_v45 = vadd.f32 %v653_v34, %v626_v32  ;;  %787 = vadd.xlane.f32.xlu1 %v786_v35  ;;  %v783_v31 = vsel %vm632_vm1, %v771_v13, 0.0  ;;  %v736_v52 = vadd.f32 %v735_v11, %v734_v9  ;;  %v1878_v60 = vsub.f32 %v1800_v0, %v669_v12 }
  0xfc   : > { %v774_v59 = vmul.f32 %v1862_v53, %v1862_v53  ;;  %v1875_v57 = vmul.f32 0.0028571428, %v664_v24  ;;  %784 = vadd.xlane.f32.xlu0 %v783_v31  ;;  %v729_v39 = vadd.f32 %v706_v40, %v705_v26  ;;  %v1881_v48 = vsub.f32 %v1688_v37, %v668_v51 }
  0xfd   : > { %v730_v32 = vsel %vm592_vm0, %v707_v30, 0.0  ;;  %v1886_v49 = vsub.f32 %v1695_v42, %v668_v51  ;;  %v714_v1 = vmul.f32 %v1870_v38, %v1870_v38  ;;  %v671_v2 = vmul.f32 0.0028571428, %v663_v45 }
  0xfe   : > { %v792_v36 = vsel %vm632_vm1, %v774_v59, 0.0  ;;  %v773_v44 = vmul.f32 %v1878_v60, %v1878_v60  ;;  %v715_v0 = vmul.f32 %v1881_v48, %v1881_v48  ;;  %v1895_v37 = vsub.f32 %v1654_v14, %v667_v61 }
  0xff   : > { %793 = vadd.xlane.f32.xlu1 %v792_v36  ;;  %v716_v4 = vmul.f32 %v1886_v49, %v1886_v49  ;;  %v1900_v42 = vsub.f32 %v1657_v15, %v667_v61  ;;  %v1903_v51 = vsub.f32 %v1660_v16, %v667_v61  ;;  %v1906_v9 = vsub.f32 %v1715_v55, %v670_v17 }
 0x100   : > { %v789_v20 = vsel %vm632_vm1, %v773_v44, 0.0  ;;  %v744_v25 = vadd.f32 %v715_v0, %v714_v1  ;;  %v711_v14 = vmul.f32 %v1895_v37, %v1895_v37  ;;  %v1912_v22 = vsub.f32 %v1717_v56, %v670_v17 }
 0x101   : > { %790 = vadd.xlane.f32.xlu0 %v789_v20  ;;  %v745_v33 = vsel %vm592_vm0, %v716_v4, 0.0  ;;  %v712_v15 = vmul.f32 %v1900_v42, %v1900_v42  ;;  %v713_v16 = vmul.f32 %v1903_v51, %v1903_v51  ;;  %v1920_v55 = vsub.f32 %v1724_v62, %v670_v17 }
 0x102   : > { %v731_v61 = vadd.f32 %v730_v32, %v729_v39  ;;  %v720_v11 = vmul.f32 %v1906_v9, %v1906_v9  ;;  %v721_v56 = vmul.f32 %v1912_v22, %v1912_v22  ;;  %v1927_v26 = vsub.f32 %v1726_v63, %v669_v12 }
 0x103   : > { %737 = vadd.xlane.f32.xlu1 %v736_v52  ;;  %v739_v24 = vadd.f32 %v712_v15, %v711_v14  ;;  %v740_v13 = vsel %vm592_vm0, %v713_v16, 0.0  ;;  %v722_v34 = vmul.f32 %v1920_v55, %v1920_v55  ;;  %v1933_v62 = vsub.f32 %v1735_v5, %v669_v12 }
 0x104   : > { %v746_v17 = vadd.f32 %v745_v33, %v744_v25  ;;  %v1936_v35 = vsub.f32 %v1737_v6, %v669_v12  ;;  %v717_v40 = vmul.f32 %v1927_v26, %v1927_v26  ;;  %v1942_v63 = vsub.f32 %v1749_v18, %v1875_v57 }
 0x105   : > { %732 = vadd.xlane.f32.xlu0 %v731_v61  ;;  %v741_v30 = vadd.f32 %v740_v13, %v739_v24  ;;  %v754_v45 = vadd.f32 %v721_v56, %v720_v11  ;;  %v718_v31 = vmul.f32 %v1933_v62, %v1933_v62  ;;  %v1948_v5 = vsub.f32 %v1751_v19, %v1875_v57 }
 0x106   : > { %v755_v6 = vsel %vm592_vm0, %v722_v34, 0.0  ;;  %v719_v12 = vmul.f32 %v1936_v35, %v1936_v35  ;;  %v1955_v59 = vsub.f32 %v1757_v23, %v1875_v57  ;;  %v726_v18 = vmul.f32 %v1942_v63, %v1942_v63 }
 0x107   : > { %747 = vadd.xlane.f32.xlu1 %v746_v17  ;;  %v749_v52 = vadd.f32 %v718_v31, %v717_v40  ;;  %v727_v39 = vmul.f32 %v1948_v5, %v1948_v5  ;;  %v1962_v19 = vsub.f32 %v1762_v27, %v671_v2  ;;  %v1965_v36 = vsub.f32 %v1765_v28, %v671_v2 }
 0x108   : > { %v750_v32 = vsel %vm592_vm0, %v719_v12, 0.0  ;;  %v728_v23 = vmul.f32 %v1955_v59, %v1955_v59  ;;  %v1971_v1 = vsub.f32 %v1768_v29, %v671_v2  ;;  %v756_v44 = vadd.f32 %v755_v6, %v754_v45 }
 0x109   : > { %742 = vadd.xlane.f32.xlu0 %v741_v30  ;;  %v764_v0 = vadd.f32 %v727_v39, %v726_v18  ;;  %v723_v4 = vmul.f32 %v1962_v19, %v1962_v19  ;;  %v724_v27 = vmul.f32 %v1965_v36, %v1965_v36  ;;  %v1982_v25 = vsub.f32 %v1805_v3, %v1875_v57 }
 0x10a   : > { %v765_v28 = vsel %vm592_vm0, %v728_v23, 0.0  ;;  %v725_v20 = vmul.f32 %v1971_v1, %v1971_v1  ;;  %v751_v29 = vadd.f32 %v750_v32, %v749_v52  ;;  %v1986_v15 = vsub.f32 %v1809_v7, %v671_v2 }
 0x10b   : > { %757 = vadd.xlane.f32.xlu1 %v756_v44  ;;  %v759_v14 = vadd.f32 %v724_v27, %v723_v4  ;;  %v766_v16 = vadd.f32 %v765_v28, %v764_v0  ;;  %v776_v61 = vmul.f32 %v1982_v25, %v1982_v25  ;;  %v859_v27 = vlaneseq }
 0x10c   : > { %v760_v33 = vsel %vm592_vm0, %v725_v20, 0.0  ;;  %v775_v56 = vmul.f32 %v1986_v15, %v1986_v15 }
 0x10d   : > { %752 = vadd.xlane.f32.xlu0 %v751_v29  ;;  %v761_v11 = vadd.f32 %v760_v33, %v759_v14  ;;  %v798_v3 = vsel %vm632_vm1, %v776_v61, 0.0 }
 0x10e   : > { %v795_v57 = vsel %vm632_vm1, %v775_v56, 0.0  ;;  %v860_v56 = vshrl.u32 %v859_v27, 7 }
 0x10f   : > { %767 = vadd.xlane.f32.xlu1 %v766_v16 }
 0x111   : > { %762 = vadd.xlane.f32.xlu0 %v761_v11 }
 0x113   : > { %799 = vadd.xlane.f32.xlu1 %v798_v3 }
 0x115   : > { %796 = vadd.xlane.f32.xlu0 %v795_v57 }
 0x180   : > { %v782_v24 = vpop.xlane.xlu1 %781 }
 0x181   : > { %v779_v7 = vpop.xlane.xlu0 %778 }
 0x184   : > { %v788_v2 = vpop.xlane.xlu1 %787 }
 0x185   : > { %v785_v13 = vpop.xlane.xlu0 %784 }
 0x188   : > { %v794_v34 = vpop.xlane.xlu1 %793 }
 0x18a   : > { %v791_v17 = vpop.xlane.xlu0 %790 }
 0x18c   : > { %v738_v40 = vpop.xlane.xlu1 %737 }
 0x18d   : > { %v802_v30 = vadd.f32 %v782_v24, %v738_v40  ;;  %v865_v40 = vsub.s32 1, %v860_v56 }
 0x18e   : > { %v733_v45 = vpop.xlane.xlu0 %732 }
 0x18f   : > { %v810_v31 = vmul.f32 0.0028571428, %v802_v30  ;;  %v801_v6 = vadd.f32 %v779_v7, %v733_v45  ;;  %v869_v30 = vsub.s32 2, %v860_v56 }
 0x190   : > { %v748_v12 = vpop.xlane.xlu1 %747 }
 0x191   : > { %v818_v18 = vadd.f32 1e-12, %v810_v31  ;;  %v809_v52 = vmul.f32 0.0028571428, %v801_v6  ;;  %v804_v39 = vadd.f32 %v788_v2, %v748_v12 }
 0x192   : > { %v743_v32 = vpop.xlane.xlu0 %742 }
 0x193   : > { %1357 = vrsqrt.f32 %v818_v18  ;;  %v817_v23 = vadd.f32 1e-12, %v809_v52  ;;  %v812_v44 = vmul.f32 0.0028571428, %v804_v39  ;;  %v803_v0 = vadd.f32 %v785_v13, %v743_v32 }
 0x194   : > { %v758_v4 = vpop.xlane.xlu1 %757  ;;  %v861_v13 = vsub.s32 0, %v860_v56 }
 0x195   : > { %1359 = vrsqrt.f32 %v817_v23  ;;  %v820_v28 = vadd.f32 1e-12, %v812_v44  ;;  %v811_v20 = vmul.f32 0.0028571428, %v803_v0  ;;  %v806_v29 = vadd.f32 %v794_v34, %v758_v4  ;;  %v833_v34 = vld [vmem:[%s2261_s4] sm:$0x7] }
 0x196   : > { %v753_v14 = vpop.xlane.xlu0 %752  ;;  %v2000_v52 = vrot.slane %v833_v34, %v861_v13  ;;  %v2002_v39 = vrot.slane %v833_v34, %v865_v40  ;;  %v2004_v32 = vrot.slane %v833_v34, %v869_v30 }
 0x197   : > { %1361 = vrsqrt.f32 %v820_v28  ;;  %v819_v33 = vadd.f32 1e-12, %v811_v20  ;;  %v814_v16 = vmul.f32 0.0028571428, %v806_v29  ;;  %v805_v61 = vadd.f32 %v791_v17, %v753_v14  ;;  %v898_v17 = vld [vmem:[%s2263_s6] sm:$0x7] }
 0x198   : > { %v768_v11 = vpop.xlane.xlu1 %767  ;;  %v2006_v23 = vrot.slane %v898_v17, %v861_v13  ;;  %v2013_v28 = vld [vmem:[%s2262_s5] ss:$0 sm:$0xff] }
 0x199   : > { %1363 = vrsqrt.f32 %v819_v33  ;;  %v822_v3 = vadd.f32 1e-12, %v814_v16  ;;  %v813_v57 = vmul.f32 0.0028571428, %v805_v61  ;;  %v2019_v33 = vrot.slane %v898_v17, %v865_v40 }
 0x19a   : > { %v763_v24 = vpop.xlane.xlu0 %762  ;;  %v2021_v16 = vrot.slane %v898_v17, %v869_v30 }
 0x19b   : > { %1365 = vrsqrt.f32 %v822_v3  ;;  %v821_v7 = vadd.f32 1e-12, %v813_v57 }
 0x19c   : > { %v800_v2 = vpop.xlane.xlu1 %799 }
 0x19d   : > { %1367 = vrsqrt.f32 %v821_v7  ;;  %v808_v45 = vadd.f32 %v800_v2, %v768_v11  ;;  %v2030_v11 = vld [vmem:[%s2287_s17] ss:$0 sm:$0xff] }
 0x19e   : > { %v797_v31 = vpop.xlane.xlu0 %796 }
 0x19f   : > { %v816_v6 = vmul.f32 0.0028571428, %v808_v45  ;;  %v807_v12 = vadd.f32 %v797_v31, %v763_v24 }
 0x1a0   : > { %v1358_v18 = vpop.eup %1357 }
 0x1a1   : > { %v837_v44 = vmul.f32 %v1358_v18, %v1818_v43  ;;  %v838_v0 = vmul.f32 %v1358_v18, %v1821_v46  ;;  %v824_v4 = vadd.f32 1e-12, %v816_v6  ;;  %v815_v27 = vmul.f32 0.0028571428, %v807_v12 }
 0x1a2   : > { %v2015_v20 = vpop.eup %1359  ;;  %v941_v29 = vmul.f32 %v1358_v18, %v1815_v41  ;;  %v839_v14 = vmul.f32 %v1358_v18, %v1824_v47 }
 0x1a3   : > { %v834_v43 = vmul.f32 %v2015_v20, %v1837_v54  ;;  %v835_v46 = vmul.f32 %v2015_v20, %v1845_v10  ;;  %1369 = vrsqrt.f32 %v824_v4  ;;  %v823_v61 = vadd.f32 1e-12, %v815_v27 }
 0x1a4   : > { %v2032_v41 = vpop.eup %1361  ;;  %v955_v47 = vmul.f32 %v2013_v28, %v941_v29  ;;  %v940_v56 = vmul.f32 %v2015_v20, %v1828_v58  ;;  %v877_v3 = vmul.f32 %v2000_v52, %v837_v44  ;;  %v878_v54 = vmul.f32 %v2002_v39, %v838_v0 }
 0x1a5   : > { %v843_v10 = vmul.f32 %v2032_v41, %v1870_v38  ;;  %v844_v57 = vmul.f32 %v2032_v41, %v1881_v48  ;;  %1371 = vrsqrt.f32 %v823_v61  ;;  %v943_v24 = vmul.f32 %v2032_v41, %v1842_v8 }
 0x1a6   : > { %v2045_v7 = vpop.eup %1363  ;;  %v970_v2 = vadd.f32 %v2030_v11, %v955_v47  ;;  %v954_v58 = vmul.f32 %v2013_v28, %v940_v56  ;;  %v879_v13 = vmul.f32 %v2004_v32, %v839_v14  ;;  %v918_v40 = vadd.f32 %v2006_v23, %v877_v3 }
 0x1a7   : > { %v840_v38 = vmul.f32 %v2045_v7, %v1895_v37  ;;  %v841_v48 = vmul.f32 %v2045_v7, %v1900_v42  ;;  %v942_v8 = vmul.f32 %v2045_v7, %v1849_v21  ;;  %v957_v30 = vmul.f32 %v2013_v28, %v943_v24 }
 0x1a8   : > { %v2058_v45 = vpop.eup %1365  ;;  %1011 = vrot.lane.b32.xlu1 %v970_v2, %s1451_s21  ;;  %v969_v34 = vadd.f32 %v2030_v11, %v954_v58  ;;  %v883_v17 = vmul.f32 %v2000_v52, %v843_v10  ;;  %v884_v31 = vmul.f32 %v2002_v39, %v844_v57  ;;  %v919_v37 = vadd.f32 %v2019_v33, %v878_v54 }
 0x1a9   : > { %980 = vst [vmem:[%s2067_s25 + $0x18] sm:$0xff] %v918_v40  ;;  %v849_v21 = vmul.f32 %v2058_v45, %v1906_v9  ;;  %v850_v42 = vmul.f32 %v2058_v45, %v1912_v22  ;;  %v956_v6 = vmul.f32 %v2013_v28, %v942_v8  ;;  %v972_v12 = vadd.f32 %v2030_v11, %v957_v30 }
 0x1aa   : > { %v2076_v18 = vpop.eup %1367  ;;  %1009 = vrot.lane.b32.xlu0 %v969_v34, %s1451_s21  ;;  %v945_v44 = vmul.f32 %v2058_v45, %v1862_v53  ;;  %v920_v0 = vadd.f32 %v2021_v16, %v879_v13  ;;  %v924_v9 = vadd.f32 %v2006_v23, %v883_v17  ;;  %v925_v22 = vadd.f32 %v2019_v33, %v884_v31 }
 0x1ab   : > { %981 = vst [vmem:[%s2067_s25 + $0x20] sm:$0xff] %v919_v37  ;;  %v846_v4 = vmul.f32 %v2076_v18, %v1927_v26  ;;  %v847_v27 = vmul.f32 %v2076_v18, %v1933_v62  ;;  %v971_v29 = vadd.f32 %v2030_v11, %v956_v6  ;;  %v944_v14 = vmul.f32 %v2076_v18, %v1878_v60 }
 0x1ac   : > { %v959_v53 = vmul.f32 %v2013_v28, %v945_v44  ;;  %v889_v61 = vmul.f32 %v2000_v52, %v849_v21  ;;  %v890_v47 = vmul.f32 %v2002_v39, %v850_v42  ;;  %982 = vst.msk [vmem:[%s2067_s25 + $0x28] sm:$0xff] %vm592_vm0, %v920_v0  ;;  %986 = vst [vmem:[%s2067_s25 + $0x48] sm:$0xff] %v924_v9 }
 0x1ad   : > { %987 = vst [vmem:[%s2067_s25 + $0x50] sm:$0xff] %v925_v22  ;;  %v874_v26 = vmul.f32 %v2000_v52, %v834_v43  ;;  %1013 = vrot.lane.b32.xlu1 %v971_v29, %s1451_s21  ;;  %v958_v62 = vmul.f32 %v2013_v28, %v944_v14  ;;  %v875_v60 = vmul.f32 %v2002_v39, %v835_v46 }
 0x1ae   : > { %v880_v56 = vmul.f32 %v2000_v52, %v840_v38  ;;  %v881_v3 = vmul.f32 %v2002_v39, %v841_v48  ;;  %v974_v54 = vadd.f32 %v2030_v11, %v959_v53  ;;  %v930_v10 = vadd.f32 %v2006_v23, %v889_v61 }
 0x1af   : > { %v931_v57 = vadd.f32 %v2019_v33, %v890_v47  ;;  %v886_v24 = vmul.f32 %v2000_v52, %v846_v4  ;;  %v973_v43 = vadd.f32 %v2030_v11, %v958_v62  ;;  %v887_v2 = vmul.f32 %v2002_v39, %v847_v27 }
 0x1b0   : > { %v915_v46 = vadd.f32 %v2006_v23, %v874_v26  ;;  %v916_v58 = vadd.f32 %v2019_v33, %v875_v60  ;;  %v1370_v13 = vpop.eup %1369  ;;  %992 = vst [vmem:[%s2067_s25 + $0x78] sm:$0xff] %v930_v10  ;;  %v921_v40 = vadd.f32 %v2006_v23, %v880_v56  ;;  %v922_v38 = vadd.f32 %v2019_v33, %v881_v3 }
 0x1b1   : > { %993 = vst [vmem:[%s2067_s25 + $0x80] sm:$0xff] %v931_v57  ;;  %v927_v48 = vadd.f32 %v2006_v23, %v886_v24  ;;  %v836_v8 = vmul.f32 %v2015_v20, %v1855_v50  ;;  %v855_v30 = vmul.f32 %v1370_v13, %v1942_v63  ;;  %v856_v34 = vmul.f32 %v1370_v13, %v1948_v5 }
 0x1b2   : > { %1015 = vrot.lane.b32.xlu1 %v972_v12, %s1451_s21  ;;  %1017 = vrot.lane.b32.xlu0 %v973_v43, %s1451_s21  ;;  %v947_v17 = vmul.f32 %v1370_v13, %v1982_v25  ;;  %977 = vst [vmem:[%s2067_s25] sm:$0xff] %v915_v46  ;;  %978 = vst [vmem:[%s2067_s25 + $0x8] sm:$0xff] %v916_v58  ;;  %v1372_v31 = vpop.eup %1371  ;;  %v928_v37 = vadd.f32 %v2019_v33, %v887_v2 }
 0x1b3   : > { %983 = vst [vmem:[%s2067_s25 + $0x30] sm:$0xff] %v921_v40  ;;  %984 = vst [vmem:[%s2067_s25 + $0x38] sm:$0xff] %v922_v38  ;;  %v876_v50 = vmul.f32 %v2004_v32, %v836_v8  ;;  %v842_v63 = vmul.f32 %v2045_v7, %v1903_v51  ;;  %v845_v5 = vmul.f32 %v2032_v41, %v1886_v49 }
 0x1b4   : > { %989 = vst [vmem:[%s2067_s25 + $0x60] sm:$0xff] %v927_v48  ;;  %v852_v20 = vmul.f32 %v1372_v31, %v1962_v19  ;;  %v853_v25 = vmul.f32 %v1372_v31, %v1965_v36  ;;  %v961_v21 = vmul.f32 %v2013_v28, %v947_v17  ;;  %v946_v42 = vmul.f32 %v1372_v31, %v1986_v15 }
 0x1b5   : > { %v895_v6 = vmul.f32 %v2000_v52, %v855_v30  ;;  %v896_v12 = vmul.f32 %v2002_v39, %v856_v34  ;;  %990 = vst [vmem:[%s2067_s25 + $0x68] sm:$0xff] %v928_v37  ;;  %v917_v44 = vadd.f32 %v2021_v16, %v876_v50  ;;  %v882_v51 = vmul.f32 %v2004_v32, %v842_v63 }
 0x1b6   : > { %1019 = vrot.lane.b32.xlu1 %v974_v54, %s1451_s21  ;;  %v976_v49 = vadd.f32 %v2030_v11, %v961_v21  ;;  %v960_v19 = vmul.f32 %v2013_v28, %v946_v42  ;;  %v892_v36 = vmul.f32 %v2000_v52, %v852_v20  ;;  %v893_v15 = vmul.f32 %v2002_v39, %v853_v25 }
 0x1b7   : > { %v936_v41 = vadd.f32 %v2006_v23, %v895_v6  ;;  %v937_v7 = vadd.f32 %v2019_v33, %v896_v12  ;;  %979 = vst.msk [vmem:[%s2067_s25 + $0x10] sm:$0xff] %vm592_vm0, %v917_v44  ;;  %v923_v0 = vadd.f32 %v2021_v16, %v882_v51  ;;  %v885_v9 = vmul.f32 %v2004_v32, %v845_v5 }
 0x1b8   : > { %v975_v22 = vadd.f32 %v2030_v11, %v960_v19  ;;  %v933_v28 = vadd.f32 %v2006_v23, %v892_v36  ;;  %v934_v52 = vadd.f32 %v2019_v33, %v893_v15  ;;  %v848_v39 = vmul.f32 %v2076_v18, %v1936_v35 }
 0x1b9   : > { %998 = vst [vmem:[%s2067_s25 + $0xa8] sm:$0xff] %v936_v41  ;;  %999 = vst [vmem:[%s2067_s25 + $0xb0] sm:$0xff] %v937_v7  ;;  %v926_v4 = vadd.f32 %v2021_v16, %v885_v9  ;;  %v851_v27 = vmul.f32 %v2058_v45, %v1920_v55  ;;  %v857_v11 = vmul.f32 %v1370_v13, %v1955_v59 }
 0x1ba   : > { %985 = vst.msk [vmem:[%s2067_s25 + $0x40] sm:$0xff] %vm592_vm0, %v923_v0  ;;  %v854_v23 = vmul.f32 %v1372_v31, %v1971_v1  ;;  %1023 = vrot.lane.b32.xlu1 %v976_v49, %s1451_s21  ;;  %1021 = vrot.lane.b32.xlu0 %v975_v22, %s1451_s21  ;;  %995 = vst [vmem:[%s2067_s25 + $0x90] sm:$0xff] %v933_v28  ;;  %v888_v35 = vmul.f32 %v2004_v32, %v848_v39 }
 0x1bb   : > { %996 = vst [vmem:[%s2067_s25 + $0x98] sm:$0xff] %v934_v52  ;;  %988 = vst.msk [vmem:[%s2067_s25 + $0x58] sm:$0xff] %vm592_vm0, %v926_v4  ;;  %v891_v55 = vmul.f32 %v2004_v32, %v851_v27  ;;  %v897_v59 = vmul.f32 %v2004_v32, %v857_v11 }
 0x1bc   : > { %v894_v1 = vmul.f32 %v2004_v32, %v854_v23  ;;  %v929_v33 = vadd.f32 %v2021_v16, %v888_v35 }
 0x1bd   : > { %v932_v45 = vadd.f32 %v2021_v16, %v891_v55  ;;  %v938_v18 = vadd.f32 %v2021_v16, %v897_v59 }
 0x1be   : > { %v935_v29 = vadd.f32 %v2021_v16, %v894_v1  ;;  %991 = vst.msk [vmem:[%s2067_s25 + $0x70] sm:$0xff] %vm592_vm0, %v929_v33 }
 0x1bf   : > { %994 = vst.msk [vmem:[%s2067_s25 + $0x88] sm:$0xff] %vm592_vm0, %v932_v45  ;;  %1000 = vst.msk [vmem:[%s2067_s25 + $0xb8] sm:$0xff] %vm592_vm0, %v938_v18 }
 0x1c0   : > { %997 = vst.msk [vmem:[%s2067_s25 + $0xa0] sm:$0xff] %vm592_vm0, %v935_v29 }
 0x21a   : > { %v1012_v32 = vpop.permute.xlu1 %1011 }
 0x21b   : > { %1035 = vst.msk [vmem:[%s2067_s25 + $0x28] sm:$0xff] %vm1033_vm2, %v1012_v32 }
 0x21c   : > { %v1010_v14 = vpop.permute.xlu0 %1009 }
 0x21d   : > { %1034 = vst.msk [vmem:[%s2067_s25 + $0x10] sm:$0xff] %vm1033_vm2, %v1010_v14 }
 0x21f   : > { %v1014_v16 = vpop.permute.xlu1 %1013 }
 0x220   : > { %1036 = vst.msk [vmem:[%s2067_s25 + $0x40] sm:$0xff] %vm1033_vm2, %v1014_v16 }
 0x224   : > { %v1016_v53 = vpop.permute.xlu1 %1015  ;;  %v1018_v61 = vpop.permute.xlu0 %1017 }
 0x225   : > { %1037 = vst.msk [vmem:[%s2067_s25 + $0x58] sm:$0xff] %vm1033_vm2, %v1016_v53  ;;  %1038 = vst.msk [vmem:[%s2067_s25 + $0x70] sm:$0xff] %vm1033_vm2, %v1018_v61 }
 0x228   : > { %v1020_v47 = vpop.permute.xlu1 %1019 }
 0x229   : > { %1039 = vst.msk [vmem:[%s2067_s25 + $0x88] sm:$0xff] %vm1033_vm2, %v1020_v47 }
 0x22c   : > { %v1024_v26 = vpop.permute.xlu1 %1023  ;;  %v1022_v62 = vpop.permute.xlu0 %1021 }
 0x22d   : > { %1041 = vst.msk [vmem:[%s2067_s25 + $0xb8] sm:$0xff] %vm1033_vm2, %v1024_v26  ;;  %1040 = vst.msk [vmem:[%s2067_s25 + $0xa0] sm:$0xff] %vm1033_vm2, %v1022_v62 }
 0x22e   : > { %s2288_s19 = sld [smem:[#allocation16_spill]]  ;;  %s1255_s15 = smul.u32 12, %s1431_s9 }
 0x22f   : > { %s1070_s8 = sshll.u32 %s2067_s25, 4  ;;  %s1452_s13 = smov 1536   ;;  %s1071_s8 = int_to_ptr.vmem [resolvable:$true] %s1070_s8 }
 0x230   : > { %1266 = sst [smem:[#allocation10]] (%p1568_p9), %s1452_s13  ;;  %s1453_s7 = smov 3072  }
 0x231   : > { %1267 = sst [smem:[#allocation10 + $0x1]] (%p1568_p9), %s1453_s7  ;;  %s1454_s20 = smov 4  }
 0x232   : > { %s2290_s16 = sld [smem:[#allocation23_spill]]  ;;  %s1455_s9 = smov 384  }
 0x233   : > { %1268 = sst [smem:[#allocation10 + $0x2]] (%p1568_p9), %s1454_s20  ;;  %s1456_s26 = smov 24  }
 0x234   : > { %s1256_s24 = smul.u32 48, %s2288_s19  ;;  %1269 = sst [smem:[#allocation10 + $0x3]] (%p1568_p9), %s1455_s9 }
 0x235   : > { %1270 = sst [smem:[#allocation10 + $0x4]] (%p1568_p9), %s1455_s9  ;;  %s1457_s17 = smov 131072  }
 0x236   : > { %s1057_s22 = sadd.s32 %s1256_s24, %s1255_s15  ;;  %1271 = sst [smem:[#allocation10 + $0x5]] (%p1568_p9), %s1456_s26 }
 0x237   : > { %s1246_s14 = sshll.u32 %s1057_s22, 7  ;;  %s1458_s21 = smov 0  }
 0x238   : > { %s1059_s18 = scalar_lea.hbm %s2290_s16, %s1246_s14 }
 0x239   : > { %1272 = dma.general (%p1568_p9), %s1071_s8, 3072, %s1059_s18, %s1043_s30, %s1457_s17, [#allocation10], %s1458_s21, 0  }
 0x23a PF: > { %s2291_s25 = sld [smem:[#allocation14_spill]]  ;;  %p1278_p4 = scmp.ge.s32.totalorder %s1443_s12, 2 }
 0x23c   : > { %p1275_p5 = pnand %p1278_p4, %p1575_p12 }
 0x23e   : > { %p1276_p6 = pneg %p1275_p5 }
 0x240   : > { %s1098_s15 = sand.u32 1, %s2291_s25  }
 0x241   : > { %s1099_s24 = scalar_lea.sflag [#allocation4], %s1098_s15 }
 0x242   : > { %1410 = dma.done.wait (%p1276_p6), %s1099_s24, 3072  }
 0x243   : > { %1412 = vsyncadd (%p1276_p6), %s1099_s24, 4294964224  ;;  %s24_s12 = sadd.s32 1, %s1443_s12   ;;  %s2293_s22 = sld [smem:[#allocation15_spill]] }
 0x244   : > { %p21_p7 = scmp.ge.s32.totalorder %s24_s12, 6   ;;  %s2294_s29 = sld [smem:[#allocation21_spill]] }
 0x245   : > { %s2295_s23 = sld [smem:[#allocation17_spill]]  ;;  %s2297_s27 = smov %s1419_s28 }
 0x246   : > { %s2296_s8 = sld [smem:[#allocation18_spill]]  ;;  %s2299_s30 = smov %s1435_s10 }
 0x247   : > { %s2300_s9 = smov %s1439_s11 }
 0x248   :  { %23 = sbr.rel (!%p21_p7) target bundleno = 10 (0xa), region = 159 }
 0x249   : > { %s2298_s28 = smov %s2293_s22 }
 0x24b   : > { %s2301_s10 = smov %s2295_s23 }
 0x24c   : > { %s2302_s11 = smov %s2296_s8 }
 0x24d   :  { %1104 = vsyncpa [#allocation3], 1 }
 0x24e   :  { %1106 = vsyncpa [#allocation3 + $0x1], 1 }
 0x24f   :  { %1107 = vsyncpa [#allocation4], 1 }
 0x250   :  { %1109 = vsyncpa [#allocation4 + $0x1], 1 }

</bundles_post_ra>
